<compile_context>
chip_gen: v7x
topology: tpu7x:2x2x1
jax: 0.10.0
libtpu: 0.0.40
codegen_flags: <defaults>
</compile_context>

<pallas_src>
import functools

import jax
import jax.numpy as jnp
from jax import lax
from jax.experimental import pallas as pl
from jax.experimental.pallas import tpu as pltpu

EPS = 1e-5


# ----------------------------------------------------------------------------
# Banded ("Toeplitz-in-W") weight construction, done once per conv (tiny).
#   wb[dh, p*Cin + ci, q*Cout + co] = w[dh, p - q + 1, ci, co]  if 0 <= p-q+1 < 3
#                                     0                          otherwise
# so that   y[h, q*Cout + co] = sum_dh  xh[h + dh, :] @ wb[dh]
# where xh is the flattened input with one zero row above/below (H halo); the W halo
# (zero padding) is implicit: out-of-range taps are simply absent from the band.
# ----------------------------------------------------------------------------
def build_band_weights(w, W):
    _, _, cin, cout = w.shape
    p = jnp.arange(W)[:, None]          # input column index
    q = jnp.arange(W)[None, :]          # output column index
    wb = jnp.zeros((3, W, cin, W, cout), w.dtype)
    for dw in range(3):
        sel = (p - q + 1 == dw).astype(w.dtype)                     # (W, W)
        wb = wb + w[:, dw][:, None, :, None, :] * sel[None, :, None, :, None]
    return wb.reshape(3, W * cin, W * cout)


# ----------------------------------------------------------------------------
# Fused kernel: [optional folded-BN affine + ReLU prologue] -> 3x3 conv -> bias,
# plus per-image partial BN statistics of the conv output.
#   x_ref    : (1, H, W*Cin)      lane-dense input tile (one image)
#   wb_ref   : (3, W*Cin, W*Cout) banded weights
#   b_ref    : (1, W*Cout)        bias tiled over W
#   sc_ref   : (1, W*Cin)         prologue scale  (only if apply_prologue)
#   sh_ref   : (1, W*Cin)         prologue shift  (only if apply_prologue)
#   y_ref    : (1, H, W*Cout)     conv output (pre-BN), lane-dense store
#   rsum_ref : (1, 1, W*Cout)     sum over H of y     (per image)
#   rssq_ref : (1, 1, W*Cout)     sum over H of y*y   (per image)
# ----------------------------------------------------------------------------
def conv3x3_band_kernel(*refs, apply_prologue):
    if apply_prologue:
        x_ref, wb_ref, b_ref, sc_ref, sh_ref, y_ref, rsum_ref, rssq_ref = refs
    else:
        x_ref, wb_ref, b_ref, y_ref, rsum_ref, rssq_ref = refs

    H = x_ref.shape[1]
    wcin = x_ref.shape[2]
    wcout = y_ref.shape[2]

    x2d = x_ref[0]                                        # (H, W*Cin)
    if apply_prologue:
        # Previous layer's folded BatchNorm affine + ReLU, on the lane-dense layout
        # (scale/shift pre-tiled over W in the wrapper): pure VPU work, fused for free.
        x2d = jnp.maximum(x2d * sc_ref[...] + sh_ref[...], 0.0)

    # H halo: one zero row above and below (no host-side jnp.pad, no extra HBM pass).
    zrow = jnp.zeros((1, wcin), jnp.float32)
    xh = jnp.concatenate([zrow, x2d, zrow], axis=0)       # (H+2, W*Cin)

    # Three deep-K matmuls (K = W*Cin), one per kernel row; f32 accumulation.
    acc = jnp.zeros((H, wcout), jnp.float32)
    for dh in range(3):
        acc = acc + jnp.dot(xh[dh:dh + H, :], wb_ref[dh],
                            preferred_element_type=jnp.float32)
    acc = acc + b_ref[...]

    y_ref[0] = acc                                        # lane-dense (H, W*Cout) store
    # Partial BN statistics; the remaining (N, W) fold is tiny JAX glue outside.
    rsum_ref[0] = jnp.sum(acc, axis=0, keepdims=True)
    rssq_ref[0] = jnp.sum(acc * acc, axis=0, keepdims=True)


def conv3x3_band(x_flat, wb, b_tiled, scale_t=None, shift_t=None):
    """x_flat: (N, H, W*Cin); wb: (3, W*Cin, W*Cout); b_tiled: (1, W*Cout).
    Returns (y, rowsum, rowssq): (N,H,W*Cout), (N,1,W*Cout), (N,1,W*Cout)."""
    N, H, wcin = x_flat.shape
    wcout = wb.shape[2]
    apply_prologue = scale_t is not None

    inputs = [x_flat, wb, b_tiled]
    in_specs = [
        pl.BlockSpec((1, H, wcin), lambda n: (n, 0, 0)),
        pl.BlockSpec((3, wcin, wcout), lambda n: (0, 0, 0)),
        pl.BlockSpec((1, wcout), lambda n: (0, 0)),
    ]
    if apply_prologue:
        inputs += [scale_t, shift_t]
        in_specs += [pl.BlockSpec((1, wcin), lambda n: (0, 0)),
                     pl.BlockSpec((1, wcin), lambda n: (0, 0))]

    out_shape = (jax.ShapeDtypeStruct((N, H, wcout), jnp.float32),
                 jax.ShapeDtypeStruct((N, 1, wcout), jnp.float32),
                 jax.ShapeDtypeStruct((N, 1, wcout), jnp.float32))
    out_specs = (pl.BlockSpec((1, H, wcout), lambda n: (n, 0, 0)),
                 pl.BlockSpec((1, 1, wcout), lambda n: (n, 0, 0)),
                 pl.BlockSpec((1, 1, wcout), lambda n: (n, 0, 0)))

    flops = 2 * N * H * (3 * wcin) * wcout
    bytes_accessed = 4 * (x_flat.size + wb.size + b_tiled.size
                          + N * H * wcout + 2 * N * wcout)

    return pl.pallas_call(
        functools.partial(conv3x3_band_kernel, apply_prologue=apply_prologue),
        out_shape=out_shape,
        grid=(N,),
        in_specs=in_specs,
        out_specs=out_specs,
        compiler_params=pltpu.CompilerParams(
            dimension_semantics=("parallel",),          # megacore-shardable over N
            vmem_limit_bytes=32 * 1024 * 1024),         # explicit budget; fits all gens
        cost_estimate=pl.CostEstimate(flops=flops, transcendentals=0,
                                      bytes_accessed=bytes_accessed),
    )(*inputs)


# ----------------------------------------------------------------------------
# Final folded-BN + ReLU (only the last layer needs a standalone pass, since BN
# needs global statistics before it can normalize).  Lane-dense (1, H, W*C)
# blocks, written in place via input_output_aliases (no extra HBM allocation).
# ----------------------------------------------------------------------------
def bn_relu_kernel(x_ref, sc_ref, sh_ref, o_ref):
    o_ref[...] = jnp.maximum(x_ref[...] * sc_ref[...] + sh_ref[...], 0.0)


def bn_relu_inplace(y, scale_t, shift_t):
    """y: (N, H, L); scale_t/shift_t: (1, L) tiled over W."""
    N, H, L = y.shape
    return pl.pallas_call(
        bn_relu_kernel,
        out_shape=jax.ShapeDtypeStruct((N, H, L), jnp.float32),
        grid=(N,),
        in_specs=[pl.BlockSpec((1, H, L), lambda n: (n, 0, 0)),
                  pl.BlockSpec((1, L), lambda n: (0, 0)),
                  pl.BlockSpec((1, L), lambda n: (0, 0))],
        out_specs=pl.BlockSpec((1, H, L), lambda n: (n, 0, 0)),
        input_output_aliases={0: 0},
        compiler_params=pltpu.CompilerParams(
            dimension_semantics=("parallel",)),
    )(y, scale_t, shift_t)


# ----------------------------------------------------------------------------
# BN statistic folding (training mode, biased variance) from the per-image
# partial sums emitted by the conv kernels.  Tiny (N, W*C) arrays -> plain JAX.
# ----------------------------------------------------------------------------
def bn_fold(rowsum, rowssq, gamma, beta, count, W, C, eps=EPS):
    s = rowsum.reshape(-1, W, C).sum(axis=(0, 1))
    q = rowssq.reshape(-1, W, C).sum(axis=(0, 1))
    mean = s / count
    var = jnp.maximum(q / count - mean * mean, 0.0)       # biased, like PyTorch BN
    scale = gamma / jnp.sqrt(var + eps)
    shift = beta - mean * scale
    return scale, shift


@jax.jit
def double_conv_forward(x_nchw, params):
    w1, b1, g1, be1, w2, b2, g2, be2 = params
    N, Cin, H, W = x_nchw.shape
    C1 = w1.shape[-1]
    C2 = w2.shape[-1]
    count = N * H * W

    # NCHW -> lane-dense (N, H, W*Cin).
    x_flat = jnp.transpose(x_nchw, (0, 2, 3, 1)).reshape(N, H, W * Cin)

    wb1 = build_band_weights(w1, W)
    wb2 = build_band_weights(w2, W)

    # Conv1 (+ partial BN1 stats), no prologue.
    y1, s1, q1 = conv3x3_band(x_flat, wb1, jnp.tile(b1, W)[None, :])
    sc1, sh1 = bn_fold(s1, q1, g1, be1, count, W, C1)

    # Conv2 with fused (BN1 affine + ReLU) prologue (+ partial BN2 stats).
    y2, s2, q2 = conv3x3_band(y1, wb2, jnp.tile(b2, W)[None, :],
                              jnp.tile(sc1, W)[None, :],
                              jnp.tile(sh1, W)[None, :])
    sc2, sh2 = bn_fold(s2, q2, g2, be2, count, W, C2)

    # Final BN2 affine + ReLU, in place over y2 (lane-dense layout).
    out = bn_relu_inplace(y2,
                          jnp.tile(sc2, W)[None, :],
                          jnp.tile(sh2, W)[None, :])

    return out.reshape(N, H, W, C2).transpose(0, 3, 1, 2)    # -> NCHW


# ----------------------------------------------------------------------------
# Pure-JAX reference (lax.conv, two-pass BN) for the correctness check.
# ----------------------------------------------------------------------------
def reference_forward(x_nchw, params, eps=EPS):
    w1, b1, g1, be1, w2, b2, g2, be2 = params

    def conv(x, w, b):  # x NCHW, w (3,3,Cin,Cout) -> OIHW
        w_oihw = jnp.transpose(w, (3, 2, 0, 1))
        y = lax.conv_general_dilated(x, w_oihw, (1, 1), ((1, 1), (1, 1)),
                                     dimension_numbers=("NCHW", "OIHW", "NCHW"))
        return y + b.reshape(1, -1, 1, 1)

    def bn_relu_ref(y, g, be):
        m = jnp.mean(y, axis=(0, 2, 3), keepdims=True)
        v = jnp.var(y, axis=(0, 2, 3), keepdims=True)
        yn = (y - m) / jnp.sqrt(v + eps)
        yn = yn * g.reshape(1, -1, 1, 1) + be.reshape(1, -1, 1, 1)
        return jnp.maximum(yn, 0.0)

    y = bn_relu_ref(conv(x_nchw, w1, b1), g1, be1)
    y = bn_relu_ref(conv(y, w2, b2), g2, be2)
    return y


def init_params(key, in_ch, out_ch):
    """Deterministic Conv2d-style (kaiming-uniform-ish) init; BN defaults."""
    k1, k2, k3, k4 = jax.random.split(key, 4)

    def conv_init(kw, kb, cin, cout):
        fan_in = cin * 9
        bound = 1.0 / jnp.sqrt(fan_in)
        w = jax.random.uniform(kw, (3, 3, cin, cout), jnp.float32, -bound, bound)
        b = jax.random.uniform(kb, (cout,), jnp.float32, -bound, bound)
        return w, b

    w1, b1 = conv_init(k1, k2, in_ch, out_ch)
    w2, b2 = conv_init(k3, k4, out_ch, out_ch)
    g1 = jnp.ones((out_ch,), jnp.float32)
    be1 = jnp.zeros((out_ch,), jnp.float32)
    g2 = jnp.ones((out_ch,), jnp.float32)
    be2 = jnp.zeros((out_ch,), jnp.float32)
    return (w1, b1, g1, be1, w2, b2, g2, be2)


if __name__ == "__main__":
    key = jax.random.PRNGKey(0)
    kx, kp = jax.random.split(key)

    N, in_ch, out_ch, H, W = 2, 4, 8, 16, 16
    x = jax.random.normal(kx, (N, in_ch, H, W), jnp.float32)   # NCHW like PyTorch
    params = init_params(kp, in_ch, out_ch)

    out = jax.block_until_ready(double_conv_forward(x, params))
    ref = jax.block_until_ready(reference_forward(x, params))

    assert out.shape == (N, out_ch, H, W)
    err = float(jnp.max(jnp.abs(out - ref)))
    assert jnp.allclose(out, ref, atol=1e-3, rtol=1e-3), err

    print("KERNEL_OK")
</pallas_src>

<mosaic_0001>
module attributes {stable_mosaic.version = 11 : i64} {
  func.func @conv3x3_band_kernel(%arg0: i32, %arg1: memref<1x16x64xf32, #tpu.memory_space<vmem>>, %arg2: memref<3x64x128xf32, #tpu.memory_space<vmem>>, %arg3: memref<1x128xf32, #tpu.memory_space<vmem>>, %arg4: memref<1x16x128xf32, #tpu.memory_space<vmem>>, %arg5: memref<1x1x128xf32, #tpu.memory_space<vmem>>, %arg6: memref<1x1x128xf32, #tpu.memory_space<vmem>>) attributes {dimension_semantics = [#tpu.dimension_semantics<parallel>], iteration_bounds = array<i64: 2>, scalar_prefetch = 0 : i64, scratch_operands = 0 : i64, tpu.core_type = #tpu.core_type<tc>, window_params = [{transform_indices = @transform_0, window_bounds = array<i64: 1, 16, 64>}, {pipeline_mode = #tpu.pipeline_mode<synchronous>, transform_indices = @transform_1, window_bounds = array<i64: 3, 64, 128>}, {pipeline_mode = #tpu.pipeline_mode<synchronous>, transform_indices = @transform_2, window_bounds = array<i64: 1, 128>}, {transform_indices = @transform_3, window_bounds = array<i64: 1, 16, 128>}, {transform_indices = @transform_4, window_bounds = array<i64: 1, 1, 128>}, {transform_indices = @transform_5, window_bounds = array<i64: 1, 1, 128>}]} {
    %c0 = arith.constant 0 : index
    %c0_0 = arith.constant 0 : index
    %c0_1 = arith.constant 0 : index
    %0 = vector.load %arg1[%c0, %c0_0, %c0_1] : memref<1x16x64xf32, #tpu.memory_space<vmem>>, vector<1x16x64xf32>
    %1 = vector.shape_cast %0 : vector<1x16x64xf32> to vector<16x64xf32>
    %cst = arith.constant 0.000000e+00 : f32
    %2 = vector.broadcast %cst : f32 to vector<1x64xf32>
    %3 = tpu.concatenate %2, %1, %2 in 0 : vector<1x64xf32>, vector<16x64xf32>, vector<1x64xf32> -> vector<18x64xf32>
    %cst_2 = arith.constant 0.000000e+00 : f32
    %4 = vector.broadcast %cst_2 : f32 to vector<16x128xf32>
    %5 = vector.extract_strided_slice %3 {offsets = [0, 0], sizes = [16, 64], strides = [1, 1]} : vector<18x64xf32> to vector<16x64xf32>
    %c0_3 = arith.constant 0 : index
    %c0_4 = arith.constant 0 : index
    %c0_5 = arith.constant 0 : index
    %6 = vector.load %arg2[%c0_3, %c0_4, %c0_5] : memref<3x64x128xf32, #tpu.memory_space<vmem>>, vector<1x64x128xf32>
    %7 = vector.shape_cast %6 : vector<1x64x128xf32> to vector<64x128xf32>
    %cst_6 = arith.constant dense<0.000000e+00> : vector<16x128xf32>
    %8 = tpu.matmul %5, %7, %cst_6 {dimension_numbers = #tpu.dot_dimension_numbers<[1], [0], [0], [1], [0, 0, 1, 1], [], []>} : vector<16x64xf32>, vector<64x128xf32>, vector<16x128xf32> -> vector<16x128xf32>
    %9 = arith.addf %4, %8 : vector<16x128xf32>
    %10 = vector.extract_strided_slice %3 {offsets = [1, 0], sizes = [16, 64], strides = [1, 1]} : vector<18x64xf32> to vector<16x64xf32>
    %c1 = arith.constant 1 : index
    %c0_7 = arith.constant 0 : index
    %c0_8 = arith.constant 0 : index
    %11 = vector.load %arg2[%c1, %c0_7, %c0_8] : memref<3x64x128xf32, #tpu.memory_space<vmem>>, vector<1x64x128xf32>
    %12 = vector.shape_cast %11 : vector<1x64x128xf32> to vector<64x128xf32>
    %cst_9 = arith.constant dense<0.000000e+00> : vector<16x128xf32>
    %13 = tpu.matmul %10, %12, %cst_9 {dimension_numbers = #tpu.dot_dimension_numbers<[1], [0], [0], [1], [0, 0, 1, 1], [], []>} : vector<16x64xf32>, vector<64x128xf32>, vector<16x128xf32> -> vector<16x128xf32>
    %14 = arith.addf %9, %13 : vector<16x128xf32>
    %15 = vector.extract_strided_slice %3 {offsets = [2, 0], sizes = [16, 64], strides = [1, 1]} : vector<18x64xf32> to vector<16x64xf32>
    %c2 = arith.constant 2 : index
    %c0_10 = arith.constant 0 : index
    %c0_11 = arith.constant 0 : index
    %16 = vector.load %arg2[%c2, %c0_10, %c0_11] : memref<3x64x128xf32, #tpu.memory_space<vmem>>, vector<1x64x128xf32>
    %17 = vector.shape_cast %16 : vector<1x64x128xf32> to vector<64x128xf32>
    %cst_12 = arith.constant dense<0.000000e+00> : vector<16x128xf32>
    %18 = tpu.matmul %15, %17, %cst_12 {dimension_numbers = #tpu.dot_dimension_numbers<[1], [0], [0], [1], [0, 0, 1, 1], [], []>} : vector<16x64xf32>, vector<64x128xf32>, vector<16x128xf32> -> vector<16x128xf32>
    %19 = arith.addf %14, %18 : vector<16x128xf32>
    %c0_13 = arith.constant 0 : index
    %c0_14 = arith.constant 0 : index
    %20 = vector.load %arg3[%c0_13, %c0_14] : memref<1x128xf32, #tpu.memory_space<vmem>>, vector<1x128xf32>
    %21 = vector.broadcast %20 : vector<1x128xf32> to vector<16x128xf32>
    %22 = arith.addf %19, %21 : vector<16x128xf32>
    %c0_15 = arith.constant 0 : index
    %c0_16 = arith.constant 0 : index
    %c0_17 = arith.constant 0 : index
    %23 = vector.load %arg4[%c0_15, %c0_16, %c0_17] : memref<1x16x128xf32, #tpu.memory_space<vmem>>, vector<1x16x128xf32>
    %24 = vector.shape_cast %23 : vector<1x16x128xf32> to vector<16x128xf32>
    %25 = vector.shape_cast %22 : vector<16x128xf32> to vector<1x16x128xf32>
    tpu.vector_store %arg4[%c0_15, %c0_16, %c0_17], %25 {strides = array<i32>} : memref<1x16x128xf32, #tpu.memory_space<vmem>>, vector<1x16x128xf32>,
    %cst_18 = arith.constant dense<0.000000e+00> : vector<128xf32>
    %26 = vector.multi_reduction <add>, %22, %cst_18 [0] : vector<16x128xf32> to vector<128xf32>
    %27 = vector.shape_cast %26 : vector<128xf32> to vector<1x128xf32>
    %c0_19 = arith.constant 0 : index
    %c0_20 = arith.constant 0 : index
    %c0_21 = arith.constant 0 : index
    %28 = vector.load %arg5[%c0_19, %c0_20, %c0_21] : memref<1x1x128xf32, #tpu.memory_space<vmem>>, vector<1x1x128xf32>
    %29 = vector.shape_cast %28 : vector<1x1x128xf32> to vector<1x128xf32>
    %30 = vector.shape_cast %27 : vector<1x128xf32> to vector<1x1x128xf32>
    tpu.vector_store %arg5[%c0_19, %c0_20, %c0_21], %30 {strides = array<i32>} : memref<1x1x128xf32, #tpu.memory_space<vmem>>, vector<1x1x128xf32>,
    %31 = arith.mulf %22, %22 : vector<16x128xf32>
    %cst_22 = arith.constant dense<0.000000e+00> : vector<128xf32>
    %32 = vector.multi_reduction <add>, %31, %cst_22 [0] : vector<16x128xf32> to vector<128xf32>
    %33 = vector.shape_cast %32 : vector<128xf32> to vector<1x128xf32>
    %c0_23 = arith.constant 0 : index
    %c0_24 = arith.constant 0 : index
    %c0_25 = arith.constant 0 : index
    %34 = vector.load %arg6[%c0_23, %c0_24, %c0_25] : memref<1x1x128xf32, #tpu.memory_space<vmem>>, vector<1x1x128xf32>
    %35 = vector.shape_cast %34 : vector<1x1x128xf32> to vector<1x128xf32>
    %36 = vector.shape_cast %33 : vector<1x128xf32> to vector<1x1x128xf32>
    tpu.vector_store %arg6[%c0_23, %c0_24, %c0_25], %36 {strides = array<i32>} : memref<1x1x128xf32, #tpu.memory_space<vmem>>, vector<1x1x128xf32>,
    return
  }
  func.func @transform_0(%arg0: i32) -> (i32, i32, i32) {
    %c0_i32 = arith.constant 0 : i32
    %c0_i32_0 = arith.constant 0 : i32
    %c0_i32_1 = arith.constant 0 : i32
    return %arg0, %c0_i32, %c0_i32_0 : i32, i32, i32
  }
  func.func @transform_1(%arg0: i32) -> (i32, i32, i32) {
    %c0_i32 = arith.constant 0 : i32
    %c0_i32_0 = arith.constant 0 : i32
    %c0_i32_1 = arith.constant 0 : i32
    %c0_i32_2 = arith.constant 0 : i32
    return %c0_i32, %c0_i32_0, %c0_i32_1 : i32, i32, i32
  }
  func.func @transform_2(%arg0: i32) -> (i32, i32) {
    %c0_i32 = arith.constant 0 : i32
    %c0_i32_0 = arith.constant 0 : i32
    %c0_i32_1 = arith.constant 0 : i32
    return %c0_i32, %c0_i32_0 : i32, i32
  }
  func.func @transform_3(%arg0: i32) -> (i32, i32, i32) {
    %c0_i32 = arith.constant 0 : i32
    %c0_i32_0 = arith.constant 0 : i32
    %c0_i32_1 = arith.constant 0 : i32
    return %arg0, %c0_i32, %c0_i32_0 : i32, i32, i32
  }
  func.func @transform_4(%arg0: i32) -> (i32, i32, i32) {
    %c0_i32 = arith.constant 0 : i32
    %c0_i32_0 = arith.constant 0 : i32
    %c0_i32_1 = arith.constant 0 : i32
    return %arg0, %c0_i32, %c0_i32_0 : i32, i32, i32
  }
  func.func @transform_5(%arg0: i32) -> (i32, i32, i32) {
    %c0_i32 = arith.constant 0 : i32
    %c0_i32_0 = arith.constant 0 : i32
    %c0_i32_1 = arith.constant 0 : i32
    return %arg0, %c0_i32, %c0_i32_0 : i32, i32, i32
  }
}

module attributes {stable_mosaic.version = 11 : i64} {
  func.func @conv3x3_band_kernel(%arg0: i32, %arg1: memref<1x16x128xf32, #tpu.memory_space<vmem>>, %arg2: memref<3x128x128xf32, #tpu.memory_space<vmem>>, %arg3: memref<1x128xf32, #tpu.memory_space<vmem>>, %arg4: memref<1x128xf32, #tpu.memory_space<vmem>>, %arg5: memref<1x128xf32, #tpu.memory_space<vmem>>, %arg6: memref<1x16x128xf32, #tpu.memory_space<vmem>>, %arg7: memref<1x1x128xf32, #tpu.memory_space<vmem>>, %arg8: memref<1x1x128xf32, #tpu.memory_space<vmem>>) attributes {dimension_semantics = [#tpu.dimension_semantics<parallel>], iteration_bounds = array<i64: 2>, scalar_prefetch = 0 : i64, scratch_operands = 0 : i64, tpu.core_type = #tpu.core_type<tc>, window_params = [{transform_indices = @transform_0, window_bounds = array<i64: 1, 16, 128>}, {pipeline_mode = #tpu.pipeline_mode<synchronous>, transform_indices = @transform_1, window_bounds = array<i64: 3, 128, 128>}, {pipeline_mode = #tpu.pipeline_mode<synchronous>, transform_indices = @transform_2, window_bounds = array<i64: 1, 128>}, {pipeline_mode = #tpu.pipeline_mode<synchronous>, transform_indices = @transform_3, window_bounds = array<i64: 1, 128>}, {pipeline_mode = #tpu.pipeline_mode<synchronous>, transform_indices = @transform_4, window_bounds = array<i64: 1, 128>}, {transform_indices = @transform_5, window_bounds = array<i64: 1, 16, 128>}, {transform_indices = @transform_6, window_bounds = array<i64: 1, 1, 128>}, {transform_indices = @transform_7, window_bounds = array<i64: 1, 1, 128>}]} {
    %c0 = arith.constant 0 : index
    %c0_0 = arith.constant 0 : index
    %c0_1 = arith.constant 0 : index
    %0 = vector.load %arg1[%c0, %c0_0, %c0_1] : memref<1x16x128xf32, #tpu.memory_space<vmem>>, vector<1x16x128xf32>
    %1 = vector.shape_cast %0 : vector<1x16x128xf32> to vector<16x128xf32>
    %c0_2 = arith.constant 0 : index
    %c0_3 = arith.constant 0 : index
    %2 = vector.load %arg4[%c0_2, %c0_3] : memref<1x128xf32, #tpu.memory_space<vmem>>, vector<1x128xf32>
    %3 = vector.broadcast %2 : vector<1x128xf32> to vector<16x128xf32>
    %4 = arith.mulf %1, %3 : vector<16x128xf32>
    %c0_4 = arith.constant 0 : index
    %c0_5 = arith.constant 0 : index
    %5 = vector.load %arg5[%c0_4, %c0_5] : memref<1x128xf32, #tpu.memory_space<vmem>>, vector<1x128xf32>
    %6 = vector.broadcast %5 : vector<1x128xf32> to vector<16x128xf32>
    %7 = arith.addf %4, %6 : vector<16x128xf32>
    %cst = arith.constant 0.000000e+00 : f32
    %8 = vector.broadcast %cst : f32 to vector<16x128xf32>
    %9 = arith.maximumf %7, %8 : vector<16x128xf32>
    %cst_6 = arith.constant 0.000000e+00 : f32
    %10 = vector.broadcast %cst_6 : f32 to vector<1x128xf32>
    %11 = tpu.concatenate %10, %9, %10 in 0 : vector<1x128xf32>, vector<16x128xf32>, vector<1x128xf32> -> vector<18x128xf32>
    %cst_7 = arith.constant 0.000000e+00 : f32
    %12 = vector.broadcast %cst_7 : f32 to vector<16x128xf32>
    %13 = vector.extract_strided_slice %11 {offsets = [0, 0], sizes = [16, 128], strides = [1, 1]} : vector<18x128xf32> to vector<16x128xf32>
    %c0_8 = arith.constant 0 : index
    %c0_9 = arith.constant 0 : index
    %c0_10 = arith.constant 0 : index
    %14 = vector.load %arg2[%c0_8, %c0_9, %c0_10] : memref<3x128x128xf32, #tpu.memory_space<vmem>>, vector<1x128x128xf32>
    %15 = vector.shape_cast %14 : vector<1x128x128xf32> to vector<128x128xf32>
    %cst_11 = arith.constant dense<0.000000e+00> : vector<16x128xf32>
    %16 = tpu.matmul %13, %15, %cst_11 {dimension_numbers = #tpu.dot_dimension_numbers<[1], [0], [0], [1], [0, 0, 1, 1], [], []>} : vector<16x128xf32>, vector<128x128xf32>, vector<16x128xf32> -> vector<16x128xf32>
    %17 = arith.addf %12, %16 : vector<16x128xf32>
    %18 = vector.extract_strided_slice %11 {offsets = [1, 0], sizes = [16, 128], strides = [1, 1]} : vector<18x128xf32> to vector<16x128xf32>
    %c1 = arith.constant 1 : index
    %c0_12 = arith.constant 0 : index
    %c0_13 = arith.constant 0 : index
    %19 = vector.load %arg2[%c1, %c0_12, %c0_13] : memref<3x128x128xf32, #tpu.memory_space<vmem>>, vector<1x128x128xf32>
    %20 = vector.shape_cast %19 : vector<1x128x128xf32> to vector<128x128xf32>
    %cst_14 = arith.constant dense<0.000000e+00> : vector<16x128xf32>
    %21 = tpu.matmul %18, %20, %cst_14 {dimension_numbers = #tpu.dot_dimension_numbers<[1], [0], [0], [1], [0, 0, 1, 1], [], []>} : vector<16x128xf32>, vector<128x128xf32>, vector<16x128xf32> -> vector<16x128xf32>
    %22 = arith.addf %17, %21 : vector<16x128xf32>
    %23 = vector.extract_strided_slice %11 {offsets = [2, 0], sizes = [16, 128], strides = [1, 1]} : vector<18x128xf32> to vector<16x128xf32>
    %c2 = arith.constant 2 : index
    %c0_15 = arith.constant 0 : index
    %c0_16 = arith.constant 0 : index
    %24 = vector.load %arg2[%c2, %c0_15, %c0_16] : memref<3x128x128xf32, #tpu.memory_space<vmem>>, vector<1x128x128xf32>
    %25 = vector.shape_cast %24 : vector<1x128x128xf32> to vector<128x128xf32>
    %cst_17 = arith.constant dense<0.000000e+00> : vector<16x128xf32>
    %26 = tpu.matmul %23, %25, %cst_17 {dimension_numbers = #tpu.dot_dimension_numbers<[1], [0], [0], [1], [0, 0, 1, 1], [], []>} : vector<16x128xf32>, vector<128x128xf32>, vector<16x128xf32> -> vector<16x128xf32>
    %27 = arith.addf %22, %26 : vector<16x128xf32>
    %c0_18 = arith.constant 0 : index
    %c0_19 = arith.constant 0 : index
    %28 = vector.load %arg3[%c0_18, %c0_19] : memref<1x128xf32, #tpu.memory_space<vmem>>, vector<1x128xf32>
    %29 = vector.broadcast %28 : vector<1x128xf32> to vector<16x128xf32>
    %30 = arith.addf %27, %29 : vector<16x128xf32>
    %c0_20 = arith.constant 0 : index
    %c0_21 = arith.constant 0 : index
    %c0_22 = arith.constant 0 : index
    %31 = vector.load %arg6[%c0_20, %c0_21, %c0_22] : memref<1x16x128xf32, #tpu.memory_space<vmem>>, vector<1x16x128xf32>
    %32 = vector.shape_cast %31 : vector<1x16x128xf32> to vector<16x128xf32>
    %33 = vector.shape_cast %30 : vector<16x128xf32> to vector<1x16x128xf32>
    tpu.vector_store %arg6[%c0_20, %c0_21, %c0_22], %33 {strides = array<i32>} : memref<1x16x128xf32, #tpu.memory_space<vmem>>, vector<1x16x128xf32>,
    %cst_23 = arith.constant dense<0.000000e+00> : vector<128xf32>
    %34 = vector.multi_reduction <add>, %30, %cst_23 [0] : vector<16x128xf32> to vector<128xf32>
    %35 = vector.shape_cast %34 : vector<128xf32> to vector<1x128xf32>
    %c0_24 = arith.constant 0 : index
    %c0_25 = arith.constant 0 : index
    %c0_26 = arith.constant 0 : index
    %36 = vector.load %arg7[%c0_24, %c0_25, %c0_26] : memref<1x1x128xf32, #tpu.memory_space<vmem>>, vector<1x1x128xf32>
    %37 = vector.shape_cast %36 : vector<1x1x128xf32> to vector<1x128xf32>
    %38 = vector.shape_cast %35 : vector<1x128xf32> to vector<1x1x128xf32>
    tpu.vector_store %arg7[%c0_24, %c0_25, %c0_26], %38 {strides = array<i32>} : memref<1x1x128xf32, #tpu.memory_space<vmem>>, vector<1x1x128xf32>,
    %39 = arith.mulf %30, %30 : vector<16x128xf32>
    %cst_27 = arith.constant dense<0.000000e+00> : vector<128xf32>
    %40 = vector.multi_reduction <add>, %39, %cst_27 [0] : vector<16x128xf32> to vector<128xf32>
    %41 = vector.shape_cast %40 : vector<128xf32> to vector<1x128xf32>
    %c0_28 = arith.constant 0 : index
    %c0_29 = arith.constant 0 : index
    %c0_30 = arith.constant 0 : index
    %42 = vector.load %arg8[%c0_28, %c0_29, %c0_30] : memref<1x1x128xf32, #tpu.memory_space<vmem>>, vector<1x1x128xf32>
    %43 = vector.shape_cast %42 : vector<1x1x128xf32> to vector<1x128xf32>
    %44 = vector.shape_cast %41 : vector<1x128xf32> to vector<1x1x128xf32>
    tpu.vector_store %arg8[%c0_28, %c0_29, %c0_30], %44 {strides = array<i32>} : memref<1x1x128xf32, #tpu.memory_space<vmem>>, vector<1x1x128xf32>,
    return
  }
  func.func @transform_0(%arg0: i32) -> (i32, i32, i32) {
    %c0_i32 = arith.constant 0 : i32
    %c0_i32_0 = arith.constant 0 : i32
    %c0_i32_1 = arith.constant 0 : i32
    return %arg0, %c0_i32, %c0_i32_0 : i32, i32, i32
  }
  func.func @transform_1(%arg0: i32) -> (i32, i32, i32) {
    %c0_i32 = arith.constant 0 : i32
    %c0_i32_0 = arith.constant 0 : i32
    %c0_i32_1 = arith.constant 0 : i32
    %c0_i32_2 = arith.constant 0 : i32
    return %c0_i32, %c0_i32_0, %c0_i32_1 : i32, i32, i32
  }
  func.func @transform_2(%arg0: i32) -> (i32, i32) {
    %c0_i32 = arith.constant 0 : i32
    %c0_i32_0 = arith.constant 0 : i32
    %c0_i32_1 = arith.constant 0 : i32
    return %c0_i32, %c0_i32_0 : i32, i32
  }
  func.func @transform_3(%arg0: i32) -> (i32, i32) {
    %c0_i32 = arith.constant 0 : i32
    %c0_i32_0 = arith.constant 0 : i32
    %c0_i32_1 = arith.constant 0 : i32
    return %c0_i32, %c0_i32_0 : i32, i32
  }
  func.func @transform_4(%arg0: i32) -> (i32, i32) {
    %c0_i32 = arith.constant 0 : i32
    %c0_i32_0 = arith.constant 0 : i32
    %c0_i32_1 = arith.constant 0 : i32
    return %c0_i32, %c0_i32_0 : i32, i32
  }
  func.func @transform_5(%arg0: i32) -> (i32, i32, i32) {
    %c0_i32 = arith.constant 0 : i32
    %c0_i32_0 = arith.constant 0 : i32
    %c0_i32_1 = arith.constant 0 : i32
    return %arg0, %c0_i32, %c0_i32_0 : i32, i32, i32
  }
  func.func @transform_6(%arg0: i32) -> (i32, i32, i32) {
    %c0_i32 = arith.constant 0 : i32
    %c0_i32_0 = arith.constant 0 : i32
    %c0_i32_1 = arith.constant 0 : i32
    return %arg0, %c0_i32, %c0_i32_0 : i32, i32, i32
  }
  func.func @transform_7(%arg0: i32) -> (i32, i32, i32) {
    %c0_i32 = arith.constant 0 : i32
    %c0_i32_0 = arith.constant 0 : i32
    %c0_i32_1 = arith.constant 0 : i32
    return %arg0, %c0_i32, %c0_i32_0 : i32, i32, i32
  }
}

module attributes {stable_mosaic.version = 11 : i64} {
  func.func @bn_relu_kernel(%arg0: i32, %arg1: memref<1x16x128xf32, #tpu.memory_space<vmem>>, %arg2: memref<1x128xf32, #tpu.memory_space<vmem>>, %arg3: memref<1x128xf32, #tpu.memory_space<vmem>>, %arg4: memref<1x16x128xf32, #tpu.memory_space<vmem>>) attributes {dimension_semantics = [#tpu.dimension_semantics<parallel>], iteration_bounds = array<i64: 2>, scalar_prefetch = 0 : i64, scratch_operands = 0 : i64, tpu.core_type = #tpu.core_type<tc>, window_params = [{transform_indices = @transform_0, window_bounds = array<i64: 1, 16, 128>}, {pipeline_mode = #tpu.pipeline_mode<synchronous>, transform_indices = @transform_1, window_bounds = array<i64: 1, 128>}, {pipeline_mode = #tpu.pipeline_mode<synchronous>, transform_indices = @transform_2, window_bounds = array<i64: 1, 128>}, {transform_indices = @transform_3, window_bounds = array<i64: 1, 16, 128>}]} {
    %c0 = arith.constant 0 : index
    %c0_0 = arith.constant 0 : index
    %c0_1 = arith.constant 0 : index
    %0 = vector.load %arg1[%c0, %c0_0, %c0_1] : memref<1x16x128xf32, #tpu.memory_space<vmem>>, vector<1x16x128xf32>
    %c0_2 = arith.constant 0 : index
    %c0_3 = arith.constant 0 : index
    %1 = vector.load %arg2[%c0_2, %c0_3] : memref<1x128xf32, #tpu.memory_space<vmem>>, vector<1x128xf32>
    %2 = vector.shape_cast %1 : vector<1x128xf32> to vector<1x1x128xf32>
    %3 = vector.broadcast %2 : vector<1x1x128xf32> to vector<1x16x128xf32>
    %4 = arith.mulf %0, %3 : vector<1x16x128xf32>
    %c0_4 = arith.constant 0 : index
    %c0_5 = arith.constant 0 : index
    %5 = vector.load %arg3[%c0_4, %c0_5] : memref<1x128xf32, #tpu.memory_space<vmem>>, vector<1x128xf32>
    %6 = vector.shape_cast %5 : vector<1x128xf32> to vector<1x1x128xf32>
    %7 = vector.broadcast %6 : vector<1x1x128xf32> to vector<1x16x128xf32>
    %8 = arith.addf %4, %7 : vector<1x16x128xf32>
    %cst = arith.constant 0.000000e+00 : f32
    %9 = vector.broadcast %cst : f32 to vector<1x16x128xf32>
    %10 = arith.maximumf %8, %9 : vector<1x16x128xf32>
    %c0_6 = arith.constant 0 : index
    %c0_7 = arith.constant 0 : index
    %c0_8 = arith.constant 0 : index
    %11 = vector.load %arg4[%c0_6, %c0_7, %c0_8] : memref<1x16x128xf32, #tpu.memory_space<vmem>>, vector<1x16x128xf32>
    tpu.vector_store %arg4[%c0_6, %c0_7, %c0_8], %10 {strides = array<i32>} : memref<1x16x128xf32, #tpu.memory_space<vmem>>, vector<1x16x128xf32>,
    return
  }
  func.func @transform_0(%arg0: i32) -> (i32, i32, i32) {
    %c0_i32 = arith.constant 0 : i32
    %c0_i32_0 = arith.constant 0 : i32
    %c0_i32_1 = arith.constant 0 : i32
    return %arg0, %c0_i32, %c0_i32_0 : i32, i32, i32
  }
  func.func @transform_1(%arg0: i32) -> (i32, i32) {
    %c0_i32 = arith.constant 0 : i32
    %c0_i32_0 = arith.constant 0 : i32
    %c0_i32_1 = arith.constant 0 : i32
    return %c0_i32, %c0_i32_0 : i32, i32
  }
  func.func @transform_2(%arg0: i32) -> (i32, i32) {
    %c0_i32 = arith.constant 0 : i32
    %c0_i32_0 = arith.constant 0 : i32
    %c0_i32_1 = arith.constant 0 : i32
    return %c0_i32, %c0_i32_0 : i32, i32
  }
  func.func @transform_3(%arg0: i32) -> (i32, i32, i32) {
    %c0_i32 = arith.constant 0 : i32
    %c0_i32_0 = arith.constant 0 : i32
    %c0_i32_1 = arith.constant 0 : i32
    return %arg0, %c0_i32, %c0_i32_0 : i32, i32, i32
  }
}

</mosaic_0001>

<bundles_post_ra>
// kernel: tile.33
= control target key start
LH: loop header
LB: loop body
LE: loop exit
PB: predicated region body
PF: predicated region fallthrough
CT: control target
= control target key end

     0   :  { %s28_s0 = inlined_call_operand.vmem [shape: f32[8], index: 0, kind: input, shape index: {}]   ;;  %s29_s1 = inlined_call_operand.vmem [shape: f32[16,8], index: 1, kind: output, shape index: {}]  }
   0x1   :  { %v4_v0 = vld [vmem:[%s28_s0] ss:$0 sm:$0xff] }
   0x2   :  { %5 = vst [vmem:[%s29_s1] sm:$0xff] %v4_v0  ;;  %8 = vst [vmem:[%s29_s1 + $0x8] sm:$0xff] %v4_v0 }

// kernel: tile.34
= control target key start
LH: loop header
LB: loop body
LE: loop exit
PB: predicated region body
PF: predicated region fallthrough
CT: control target
= control target key end

     0   :  { %s131_s10 = smov 120   ;;  %s132_s11 = smov 104   ;;  %vm3_vm0 = vcmask 64512   ;;  %vm9_vm1 = vcmask 1048512   ;;  %vm15_vm2 = vcmask 982912   ;;  %vm21_vm3 = vcmask 917312   ;;  %s207_s0 = inlined_call_operand.vmem [shape: f32[16,8], index: 0, kind: input, shape index: {}]   ;;  %s208_s1 = inlined_call_operand.vmem [shape: f32[1,128], index: 1, kind: output, shape index: {}]  }
   0x1   :  { %v101_v0 = vld [vmem:[%s207_s0 + $0xf] sm:$0x1]   ;;  %v103_v1 = vld [vmem:[%s207_s0 + $0xd] sm:$0x1]   ;;  %v102_v2 = vld [vmem:[%s207_s0 + $0xe] sm:$0x1]  }
   0x2   :  { %7 = vrot.lane.b32.xlu0 %v101_v0, %s131_s10  ;;  %19 = vrot.lane.b32.xlu1 %v103_v1, %s132_s11  ;;  %v104_v3 = vld [vmem:[%s207_s0 + $0xc] sm:$0x1]   ;;  %s133_s16 = smov 112   ;;  %s134_s17 = smov 96   ;;  %v105_v4 = vld [vmem:[%s207_s0 + $0xb] sm:$0x1]  }
   0x3   :  { %v106_v5 = vld [vmem:[%s207_s0 + $0xa] sm:$0x1]   ;;  %v2_v6 = vld [vmem:[%s207_s0] sm:$0x1]   ;;  %s135_s24 = smov 88   ;;  %s136_s25 = smov 80  }
   0x4   :  { %4 = vst.msk [vmem:[#allocation0] sm:$0x1] %vm3_vm0, %v2_v6   ;;  %v107_v7 = vld [vmem:[%s207_s0 + $0x9] sm:$0x1]   ;;  %v108_v8 = vld [vmem:[%s207_s0 + $0x8] sm:$0x1]  }
   0x5   :  { %s137_s30 = smov 72   ;;  %s138_s2 = smov 64   ;;  %v109_v9 = vld [vmem:[%s207_s0 + $0x7] sm:$0x1]   ;;  %v110_v10 = vld [vmem:[%s207_s0 + $0x6] sm:$0x1]  }
   0x6   :  { %13 = vrot.lane.b32.xlu0 %v102_v2, %s133_s16  ;;  %25 = vrot.lane.b32.xlu1 %v104_v3, %s134_s17  ;;  %s139_s7 = smov 56   ;;  %s140_s8 = smov 48   ;;  %v111_v11 = vld [vmem:[%s207_s0 + $0x5] sm:$0x1]   ;;  %v112_v12 = vld [vmem:[%s207_s0 + $0x4] sm:$0x1]  }
   0x7   :  { %s141_s13 = smov 40   ;;  %s142_s14 = smov 32   ;;  %v113_v13 = vld [vmem:[%s207_s0 + $0x3] sm:$0x1]   ;;  %v114_v14 = vld [vmem:[%s207_s0 + $0x2] sm:$0x1]  }
   0x8   :  { %s143_s19 = smov 24   ;;  %s144_s20 = smov 16   ;;  %v115_v15 = vld [vmem:[%s207_s0 + $0x1] sm:$0x1]   ;;  %vm27_vm4 = vcmask 851712   ;;  %vm33_vm5 = vcmask 786112  }
   0x9   :  { %s145_s0 = smov 8   ;;  %vm39_vm6 = vcmask 720512   ;;  %vm45_vm7 = vcmask 654912   ;;  %vm51_vm8 = vcmask 589312   ;;  %vm57_vm9 = vcmask 523712  }
   0xa   :  { %31 = vrot.lane.b32.xlu0 %v105_v4, %s135_s24  ;;  %37 = vrot.lane.b32.xlu1 %v106_v5, %s136_s25  ;;  %vm63_vm10 = vcmask 458112   ;;  %vm69_vm11 = vcmask 392512   ;;  %vm75_vm12 = vcmask 326912   ;;  %vm81_vm13 = vcmask 261312  }
   0xb   :  { %vm87_vm14 = vcmask 195712   ;;  %vm93_vm15 = vcmask 130112  }
   0xe   :  { %43 = vrot.lane.b32.xlu0 %v107_v7, %s137_s30  ;;  %49 = vrot.lane.b32.xlu1 %v108_v8, %s138_s2 }
  0x12   :  { %55 = vrot.lane.b32.xlu0 %v109_v9, %s139_s7  ;;  %61 = vrot.lane.b32.xlu1 %v110_v10, %s140_s8 }
  0x16   :  { %67 = vrot.lane.b32.xlu0 %v111_v11, %s141_s13  ;;  %73 = vrot.lane.b32.xlu1 %v112_v12, %s142_s14 }
  0x1a   :  { %79 = vrot.lane.b32.xlu0 %v113_v13, %s143_s19  ;;  %85 = vrot.lane.b32.xlu1 %v114_v14, %s144_s20 }
  0x1e   :  { %91 = vrot.lane.b32.xlu0 %v115_v15, %s145_s0 }
  0x74   :  { %v8_v16 = vpop.permute.xlu0 %7   ;;  %v20_v17 = vpop.permute.xlu1 %19  }
  0x75   :  { %10 = vst.msk [vmem:[#allocation0] sm:$0x1] %vm9_vm1, %v8_v16  }
  0x78   :  { %v14_v18 = vpop.permute.xlu0 %13   ;;  %v26_v19 = vpop.permute.xlu1 %25  }
  0x79   :  { %16 = vst.msk [vmem:[#allocation0] sm:$0x1] %vm15_vm2, %v14_v18  }
  0x7a   :  { %22 = vst.msk [vmem:[#allocation0] sm:$0x1] %vm21_vm3, %v20_v17  }
  0x7b   :  { %28 = vst.msk [vmem:[#allocation0] sm:$0x1] %vm27_vm4, %v26_v19  }
  0x7c   :  { %v32_v20 = vpop.permute.xlu0 %31   ;;  %v38_v21 = vpop.permute.xlu1 %37  }
  0x7d   :  { %34 = vst.msk [vmem:[#allocation0] sm:$0x1] %vm33_vm5, %v32_v20  }
  0x7e   :  { %40 = vst.msk [vmem:[#allocation0] sm:$0x1] %vm39_vm6, %v38_v21  }
  0x80   :  { %v44_v22 = vpop.permute.xlu0 %43   ;;  %v50_v23 = vpop.permute.xlu1 %49  }
  0x81   :  { %46 = vst.msk [vmem:[#allocation0] sm:$0x1] %vm45_vm7, %v44_v22  }
  0x82   :  { %52 = vst.msk [vmem:[#allocation0] sm:$0x1] %vm51_vm8, %v50_v23  }
  0x84   :  { %v56_v24 = vpop.permute.xlu0 %55   ;;  %v62_v25 = vpop.permute.xlu1 %61  }
  0x85   :  { %58 = vst.msk [vmem:[#allocation0] sm:$0x1] %vm57_vm9, %v56_v24  }
  0x86   :  { %64 = vst.msk [vmem:[#allocation0] sm:$0x1] %vm63_vm10, %v62_v25  }
  0x88   :  { %v68_v26 = vpop.permute.xlu0 %67   ;;  %v74_v27 = vpop.permute.xlu1 %73  }
  0x89   :  { %70 = vst.msk [vmem:[#allocation0] sm:$0x1] %vm69_vm11, %v68_v26  }
  0x8a   :  { %76 = vst.msk [vmem:[#allocation0] sm:$0x1] %vm75_vm12, %v74_v27  }
  0x8c   :  { %v80_v28 = vpop.permute.xlu0 %79   ;;  %v86_v29 = vpop.permute.xlu1 %85  }
  0x8d   :  { %82 = vst.msk [vmem:[#allocation0] sm:$0x1] %vm81_vm13, %v80_v28  }
  0x8e   :  { %88 = vst.msk [vmem:[#allocation0] sm:$0x1] %vm87_vm14, %v86_v29  }
  0x90   :  { %v92_v30 = vpop.permute.xlu0 %91  }
  0x91   :  { %94 = vst.msk [vmem:[#allocation0] sm:$0x1] %vm93_vm15, %v92_v30  }
  0x98   :  { %v98_v31 = vld [vmem:[#allocation0] sm:$0x1] }
  0x99   :  { %100 = vst [vmem:[%s208_s1] sm:$0x1] %v98_v31 }

// kernel: double_conv_forward.3
= control target key start
LH: loop header
LB: loop body
LE: loop exit
PB: predicated region body
PF: predicated region fallthrough
CT: control target
= control target key end

     0   :  { %s889_s18 = smov 0   ;;  %s1009_s0 = inlined_call_operand.vmem [shape: f32[2,16,64], index: 0, kind: input, shape index: {}]   ;;  %s1010_s1 = inlined_call_operand.vmem [shape: f32[3,64,128], index: 1, kind: input, shape index: {}]   ;;  %s1011_s2 = inlined_call_operand.vmem [shape: f32[1,128], index: 2, kind: input, shape index: {}]   ;;  %s1012_s3 = inlined_call_operand.vmem [shape: f32[2,16,128], index: 3, kind: output, shape index: {0}]   ;;  %s1013_s4 = inlined_call_operand.vmem [shape: f32[2,1,128], index: 4, kind: output, shape index: {1}]   ;;  %s1014_s5 = inlined_call_operand.vmem [shape: f32[2,1,128], index: 5, kind: output, shape index: {2}]  }
   0x1 LB: > { %s668_s19 = sadd.s32 4294967295, %s857_s18   ;;  %p672_p0 = scmp.ge.s32.totalorder %s857_s18, 1  ;;  %s857_s18 = sphi %s889_s18, %s16_s18  }
   0x2   : > { %p192_p1 = scmp.lt.s32.totalorder %s857_s18, 3 }
   0x4   : > { %p193_p2 = pnand %p672_p0, %p192_p1 }
   0x5   : > { %v254_v0 = vld [vmem:[%s1010_s1] sm:$0xff] (!%p193_p2)  ;;  %v255_v1 = vld [vmem:[%s1010_s1 + $0x8] sm:$0xff] (!%p193_p2)  ;;  %v256_v2 = vld [vmem:[%s1010_s1 + $0x10] sm:$0xff] (!%p193_p2)  ;;  %p226_p3 = scmp.lt.s32.totalorder (!%p193_p2), %s668_s19, 1  ;;  %vm246_vm0 = vcmask (!%p193_p2), 1040384   ;;  %vm279_vm1 = vcmask (!%p193_p2), 523264  }
   0x6   : > { %196 = sbr.rel (%p193_p2) target bundleno = 274 (0x112), region = 32  ;;  %v807_v3 = vpack.c.bf16 (!%p193_p2), %v255_v1, %v254_v0  ;;  %v257_v4 = vld [vmem:[%s1010_s1 + $0x18] sm:$0xff] (!%p193_p2)  ;;  %v258_v6 = vld [vmem:[%s1010_s1 + $0x20] sm:$0xff] (!%p193_p2)  ;;  %v259_v7 = vld [vmem:[%s1010_s1 + $0x28] sm:$0xff] (!%p193_p2)  ;;  %vm273_vm2 = vcmask (!%p193_p2), 1046528   ;;  %vm447_vm3 = vcmask (!%p193_p2), 1045504  }
   0x7   : > { %v811_v5 = vpack.c.bf16 (!%p193_p2), %v257_v4, %v256_v2  ;;  %v677_v8 = vld [vmem:[%s1010_s1 + $0x40] sm:$0xff] (!%p193_p2)  ;;  %v678_v9 = vld [vmem:[%s1010_s1 + $0x48] sm:$0xff] (!%p193_p2)  ;;  %v679_v11 = vld [vmem:[%s1010_s1 + $0x50] sm:$0xff] (!%p193_p2)  ;;  %v815_v13 = vpack.c.bf16 (!%p193_p2), %v259_v7, %v258_v6 }
   0x8   : > { %808 = vmatprep.subr.bf16.mxu0 (!%p193_p2), %v807_v3  ;;  %v791_v10 = vpack.c.bf16 (!%p193_p2), %v678_v9, %v677_v8  ;;  %v680_v12 = vld [vmem:[%s1010_s1 + $0x58] sm:$0xff] (!%p193_p2)  ;;  %v260_v14 = vld [vmem:[%s1010_s1 + $0x30] sm:$0xff] (!%p193_p2)  ;;  %v681_v16 = vld [vmem:[%s1010_s1 + $0x60] sm:$0xff] (!%p193_p2) }
   0x9   : > { %810 = vmatpush3.bf16.msra.mxu0 (!%p193_p2), %v807_v3  ;;  %v795_v15 = vpack.c.bf16 (!%p193_p2), %v680_v12, %v679_v11  ;;  %v682_v17 = vld [vmem:[%s1010_s1 + $0x68] sm:$0xff] (!%p193_p2)  ;;  %v261_v18 = vld [vmem:[%s1010_s1 + $0x38] sm:$0xff] (!%p193_p2)  ;;  %v683_v26 = vld [vmem:[%s1010_s1 + $0x70] sm:$0xff] (!%p193_p2) }
   0xa   : > { %812 = vmatprep.subr.bf16.mxu0 (!%p193_p2), %v811_v5  ;;  %792 = vmatprep.subr.bf16.mxu1 (!%p193_p2), %v791_v10  ;;  %v799_v23 = vpack.c.bf16 (!%p193_p2), %v682_v17, %v681_v16  ;;  %v819_v24 = vpack.c.bf16 (!%p193_p2), %v261_v18, %v260_v14  ;;  %v684_v27 = vld [vmem:[%s1010_s1 + $0x78] sm:$0xff] (!%p193_p2)  ;;  %v689_v29 = vld [vmem:[%s1010_s1 + $0x80] sm:$0xff] (!%p193_p2)  ;;  %v690_v30 = vld [vmem:[%s1010_s1 + $0x88] sm:$0xff] (!%p193_p2) }
   0xb   : > { %794 = vmatpush3.bf16.msra.mxu1 (!%p193_p2), %v791_v10  ;;  %v803_v34 = vpack.c.bf16 (!%p193_p2), %v684_v27, %v683_v26  ;;  %v823_v36 = vpack.c.bf16 (!%p193_p2), %v690_v30, %v689_v29  ;;  %v691_v39 = vld [vmem:[%s1010_s1 + $0x90] sm:$0xff] (!%p193_p2)  ;;  %v692_v40 = vld [vmem:[%s1010_s1 + $0x98] sm:$0xff] (!%p193_p2)  ;;  %v693_v44 = vld [vmem:[%s1010_s1 + $0xa0] sm:$0xff] (!%p193_p2) }
   0xc   : > { %796 = vmatprep.subr.bf16.mxu1 (!%p193_p2), %v795_v15  ;;  %v827_v42 = vpack.c.bf16 (!%p193_p2), %v692_v40, %v691_v39  ;;  %v694_v45 = vld [vmem:[%s1010_s1 + $0xa8] sm:$0xff] (!%p193_p2)  ;;  %v695_v48 = vld [vmem:[%s1010_s1 + $0xb0] sm:$0xff] (!%p193_p2)  ;;  %v696_v49 = vld [vmem:[%s1010_s1 + $0xb8] sm:$0xff] (!%p193_p2) }
   0xd   : > { %s1016_s19 = smov (!%p226_p3, %s668_s19), 1  ;;  %814 = vmatpush3.bf16.msra.mxu0 %v811_v5  ;;  %v831_v47 = vpack.c.bf16 %v694_v45, %v693_v44  ;;  %v835_v50 = vpack.c.bf16 %v696_v49, %v695_v48  ;;  %v699_v56 = vld [vmem:[%s1011_s2] ss:$0 sm:$0xff] }
   0xe   : > { %s702_s11 = sshll.u32 %s1016_s19, 4  ;;  %816 = vmatprep.subr.bf16.mxu0 %v815_v13  ;;  %s238_s8 = scalar_lea.vmem %s1013_s4, %s1016_s19 }
   0xf   : > { %s230_s22 = scalar_lea.vmem %s1009_s0, %s702_s11  ;;  %798 = vmatpush3.bf16.msra.mxu1 %v795_v15  ;;  %s235_s6 = scalar_lea.vmem %s1012_s3, %s702_s11 }
  0x10   : > { %v242_v19 = vld [vmem:[%s230_s22] sm:$0xff]  ;;  %v243_v20 = vld [vmem:[%s230_s22 + $0x8] sm:$0xff]  ;;  %800 = vmatprep.subr.bf16.mxu1 %v799_v23  ;;  %s241_s12 = scalar_lea.vmem %s1014_s5, %s1016_s19 }
  0x11   : > { %v247_v21 = vrot.slane %v242_v19, 7  ;;  %v248_v22 = vrot.slane %v243_v20, 7  ;;  %818 = vmatpush3.bf16.msra.mxu0 %v815_v13 }
  0x12   : > { %820 = vmatprep.subr.bf16.mxu0 %v819_v24 }
  0x13   : > { %v252_v25 = vsel %vm246_vm0, 0.0, %v247_v21  ;;  %v249_v31 = vsel %vm246_vm0, %v247_v21, %v248_v22  ;;  %v253_v33 = vsel %vm246_vm0, %v248_v22, 0.0  ;;  %802 = vmatpush3.bf16.msra.mxu1 %v799_v23 }
  0x14   : > { %v274_v28 = vrot.slane %v252_v25, 1  ;;  %769 = vmatprep.mubr.msk.f32.mxu0 %vm279_vm1, %v252_v25  ;;  %v275_v32 = vrot.slane %v249_v31, 1  ;;  %v448_v35 = vrot.slane %v252_v25, 2  ;;  %v449_v37 = vrot.slane %v249_v31, 2  ;;  %804 = vmatprep.subr.bf16.mxu1 %v803_v34 }
  0x15   : > { %v277_v41 = vrot.slane %v253_v33, 1  ;;  %822 = vmatpush3.bf16.msra.mxu0 %v819_v24  ;;  %v451_v51 = vrot.slane %v253_v33, 2 }
  0x16   : > { %v276_v38 = vsel %vm273_vm2, %v274_v28, %v275_v32  ;;  %824 = vmatprep.subr.bf16.mxu0 %v823_v36  ;;  %v450_v43 = vsel %vm447_vm3, %v448_v35, %v449_v37 }
  0x17   : > { %750 = vmatprep.mubr.msk.f32.mxu1 %vm279_vm1, %v276_v38  ;;  %806 = vmatpush3.bf16.msra.mxu1 %v803_v34  ;;  %v278_v46 = vsel %vm273_vm2, %v275_v32, %v277_v41  ;;  %v452_v52 = vsel %vm447_vm3, %v449_v37, %v451_v51 }
  0x18   : > { %770 = vmatmul.mubr.msk.f32.vlgmr.msra.gmra.mrb[0].mxu0 %vm279_vm1, %v249_v31 }
  0x19   : > { %826 = vmatpush3.bf16.msra.mxu0 %v823_v36  ;;  %788 = vmatprep.mubr.msk.f32.mxu0 %vm279_vm1, %v450_v43 }
  0x1a   : > { %828 = vmatprep.subr.bf16.mxu0 %v827_v42  ;;  %751 = vmatmul.mubr.msk.f32.vlgmr.msra.gmra.mrb[0].mxu1 %vm279_vm1, %v278_v46 }
  0x1d   : > { %830 = vmatpush3.bf16.msra.mxu0 %v827_v42 }
  0x1e   : > { %832 = vmatprep.subr.bf16.mxu0 %v831_v47 }
  0x21   : > { %834 = vmatpush3.bf16.msra.mxu0 %v831_v47 }
  0x22   : > { %836 = vmatprep.subr.bf16.mxu0 %v835_v50 }
  0x25   : > { %838 = vmatpush3.bf16.msra.mxu0 %v835_v50 }
  0x28   : > { %789 = vmatmul.mubr.msk.f32.vlgmr.msra.gmra.mrb[0].mxu0 %vm279_vm1, %v452_v52 }
  0xed   : > { %v752_v53 = vpop.f32.mrb[0].mxu1 }
  0xee   : > { %v350_v54 = vpop.f32.mrb[1].mxu1 }
  0xfb   : > { %v790_v55 = vpop.f32.mrb[0].mxu0 }
  0xfc   : > { %v839_v57 = vadd.f32 %v790_v55, %v752_v53  ;;  %v523_v58 = vpop.f32.mrb[1].mxu0 }
  0xfd   : > { %v840_v59 = vadd.f32 %v523_v58, %v350_v54 }
  0xfe   : > { %v542_v60 = vadd.f32 %v839_v57, %v699_v56 }
  0xff   : > { %v541_v61 = vadd.f32 %v840_v59, %v699_v56 }
 0x100   : > { %544 = vst [vmem:[%s235_s6 + $0x8] sm:$0xff] %v542_v60  ;;  %v554_v62 = vmul.f32 %v542_v60, %v542_v60 }
 0x101   : > { %543 = vst [vmem:[%s235_s6] sm:$0xff] %v541_v61  ;;  %v545_v63 = vadd.f32 %v542_v60, %v541_v61  ;;  %v553_v0 = vmul.f32 %v541_v61, %v541_v61 }
 0x103   : > { %v546_v1 = vrot.slane %v545_v63, 4  ;;  %v555_v2 = vadd.f32 %v554_v62, %v553_v0 }
 0x105   : > { %v547_v3 = vadd.f32 %v546_v1, %v545_v63  ;;  %v556_v4 = vrot.slane %v555_v2, 4 }
 0x107   : > { %v548_v5 = vrot.slane %v547_v3, 2  ;;  %v557_v6 = vadd.f32 %v556_v4, %v555_v2 }
 0x109   : > { %v549_v7 = vadd.f32 %v548_v5, %v547_v3  ;;  %v558_v8 = vrot.slane %v557_v6, 2 }
 0x10b   : > { %v550_v9 = vrot.slane %v549_v7, 1  ;;  %v559_v10 = vadd.f32 %v558_v8, %v557_v6 }
 0x10d   : > { %v551_v11 = vadd.f32 %v550_v9, %v549_v7  ;;  %v560_v12 = vrot.slane %v559_v10, 1 }
 0x10f   : > { %552 = vst [vmem:[%s238_s8] sm:$0x1] %v551_v11  ;;  %v561_v13 = vadd.f32 %v560_v12, %v559_v10 }
 0x111   : > { %562 = vst [vmem:[%s241_s12] sm:$0x1] %v561_v13 }
 0x112 PF: > { %s16_s18 = sadd.s32 1, %s857_s18  }
 0x113   : > { %p13_p4 = scmp.ge.s32.totalorder %s16_s18, 4  }
 0x115   :  { %15 = sbr.rel (!%p13_p4) target bundleno = 1 (0x1), region = 88 }

// kernel: double_conv_forward.4
= control target key start
LH: loop header
LB: loop body
LE: loop exit
PB: predicated region body
PF: predicated region fallthrough
CT: control target
= control target key end

     0   :  { %s1123_s24 = smov 0   ;;  %s1321_s0 = inlined_call_operand.vmem [shape: f32[2,16,128], index: 0, kind: input, shape index: {}]   ;;  %s1322_s1 = inlined_call_operand.vmem [shape: f32[3,128,128], index: 1, kind: input, shape index: {}]   ;;  %s1323_s2 = inlined_call_operand.vmem [shape: f32[1,128], index: 2, kind: input, shape index: {}]   ;;  %s1324_s3 = inlined_call_operand.vmem [shape: f32[1,128], index: 3, kind: input, shape index: {}]   ;;  %s1325_s4 = inlined_call_operand.vmem [shape: f32[1,128], index: 4, kind: input, shape index: {}]   ;;  %s1326_s5 = inlined_call_operand.vmem [shape: f32[2,16,128], index: 5, kind: output, shape index: {0}]   ;;  %s1327_s6 = inlined_call_operand.vmem [shape: f32[2,1,128], index: 6, kind: output, shape index: {1}]   ;;  %s1328_s7 = inlined_call_operand.vmem [shape: f32[2,1,128], index: 7, kind: output, shape index: {2}]  }
   0x1 LB: > { %s758_s25 = sadd.s32 4294967295, %s1081_s24   ;;  %p762_p0 = scmp.ge.s32.totalorder %s1081_s24, 1  ;;  %s1081_s24 = sphi %s1123_s24, %s18_s24  }
   0x2   : > { %p242_p1 = scmp.lt.s32.totalorder %s1081_s24, 3 }
   0x4   : > { %p243_p2 = pnand %p762_p0, %p242_p1 }
   0x5   : > { %v329_v0 = vld [vmem:[%s1322_s1] sm:$0xff] (!%p243_p2)  ;;  %v330_v1 = vld [vmem:[%s1322_s1 + $0x8] sm:$0xff] (!%p243_p2)  ;;  %v331_v2 = vld [vmem:[%s1322_s1 + $0x10] sm:$0xff] (!%p243_p2)  ;;  %p280_p3 = scmp.lt.s32.totalorder (!%p243_p2), %s758_s25, 1  ;;  %vm320_vm0 = vcmask (!%p243_p2), 1040384   ;;  %vm364_vm2 = vcmask (!%p243_p2), 1046528  }
   0x6   : > { %246 = sbr.rel (%p243_p2) target bundleno = 306 (0x132), region = 40  ;;  %v999_v3 = vpack.c.bf16 (!%p243_p2), %v330_v1, %v329_v0  ;;  %v332_v4 = vld [vmem:[%s1322_s1 + $0x18] sm:$0xff] (!%p243_p2)  ;;  %v333_v6 = vld [vmem:[%s1322_s1 + $0x20] sm:$0xff] (!%p243_p2)  ;;  %v334_v7 = vld [vmem:[%s1322_s1 + $0x28] sm:$0xff] (!%p243_p2)  ;;  %vm539_vm3 = vcmask (!%p243_p2), 1045504  }
   0x7   : > { %v1003_v5 = vpack.c.bf16 (!%p243_p2), %v332_v4, %v331_v2  ;;  %v335_v8 = vld [vmem:[%s1322_s1 + $0x30] sm:$0xff] (!%p243_p2)  ;;  %v1007_v9 = vpack.c.bf16 (!%p243_p2), %v334_v7, %v333_v6  ;;  %v336_v10 = vld [vmem:[%s1322_s1 + $0x38] sm:$0xff] (!%p243_p2)  ;;  %v769_v11 = vld [vmem:[%s1322_s1 + $0x80] sm:$0xff] (!%p243_p2) }
   0x8   : > { %1000 = vmatprep.subr.bf16.mxu0 (!%p243_p2), %v999_v3  ;;  %v770_v12 = vld [vmem:[%s1322_s1 + $0x88] sm:$0xff] (!%p243_p2)  ;;  %v767_v16 = vld [vmem:[%s1324_s3] ss:$0 sm:$0xff] (!%p243_p2)  ;;  %v771_v20 = vld [vmem:[%s1322_s1 + $0x90] sm:$0xff] (!%p243_p2)  ;;  %v1011_v22 = vpack.c.bf16 (!%p243_p2), %v336_v10, %v335_v8 }
   0x9   : > { %1002 = vmatpush3.bf16.msra.mxu0 (!%p243_p2), %v999_v3  ;;  %v967_v13 = vpack.c.bf16 (!%p243_p2), %v770_v12, %v769_v11  ;;  %v768_v19 = vld [vmem:[%s1325_s4] ss:$0 sm:$0xff] (!%p243_p2)  ;;  %v772_v21 = vld [vmem:[%s1322_s1 + $0x98] sm:$0xff] (!%p243_p2)  ;;  %v338_v27 = vld [vmem:[%s1322_s1 + $0x48] sm:$0xff] (!%p243_p2) }
   0xa   : > { %1004 = vmatprep.subr.bf16.mxu0 (!%p243_p2), %v1003_v5  ;;  %v773_v25 = vld [vmem:[%s1322_s1 + $0xa0] sm:$0xff] (!%p243_p2)  ;;  %v971_v28 = vpack.c.bf16 (!%p243_p2), %v772_v21, %v771_v20  ;;  %v774_v29 = vld [vmem:[%s1322_s1 + $0xa8] sm:$0xff] (!%p243_p2)  ;;  %v775_v33 = vld [vmem:[%s1322_s1 + $0xb0] sm:$0xff] (!%p243_p2) }
   0xb   : > { %968 = vmatprep.subr.bf16.mxu1 (!%p243_p2), %v967_v13  ;;  %v337_v26 = vld [vmem:[%s1322_s1 + $0x40] sm:$0xff] (!%p243_p2)  ;;  %v975_v32 = vpack.c.bf16 (!%p243_p2), %v774_v29, %v773_v25  ;;  %v776_v34 = vld [vmem:[%s1322_s1 + $0xb8] sm:$0xff] (!%p243_p2)  ;;  %vm785_vm1 = vmneg (!%p243_p2), %vm320_vm0 }
   0xc   : > { %970 = vmatpush3.bf16.msra.mxu1 (!%p243_p2), %v967_v13  ;;  %v1015_v35 = vpack.c.bf16 (!%p243_p2), %v338_v27, %v337_v26  ;;  %v339_v38 = vld [vmem:[%s1322_s1 + $0x50] sm:$0xff] (!%p243_p2)  ;;  %v340_v39 = vld [vmem:[%s1322_s1 + $0x58] sm:$0xff] (!%p243_p2)  ;;  %v979_v40 = vpack.c.bf16 (!%p243_p2), %v776_v34, %v775_v33  ;;  %v777_v42 = vld [vmem:[%s1322_s1 + $0xc0] sm:$0xff] (!%p243_p2) }
   0xd   : > { %s1330_s25 = smov (!%p280_p3, %s758_s25), 1  ;;  %1006 = vmatpush3.bf16.msra.mxu0 %v1003_v5  ;;  %972 = vmatprep.subr.bf16.mxu1 %v971_v28  ;;  %v778_v43 = vld [vmem:[%s1322_s1 + $0xc8] sm:$0xff]  ;;  %v1019_v47 = vpack.c.bf16 %v340_v39, %v339_v38  ;;  %v341_v48 = vld [vmem:[%s1322_s1 + $0x60] sm:$0xff]  ;;  %v779_v52 = vld [vmem:[%s1322_s1 + $0xd0] sm:$0xff] }
   0xe   : > { %s806_s17 = sshll.u32 %s1330_s25, 4  ;;  %1008 = vmatprep.subr.bf16.mxu0 %v1007_v9  ;;  %v342_v49 = vld [vmem:[%s1322_s1 + $0x68] sm:$0xff]  ;;  %v983_v50 = vpack.c.bf16 %v778_v43, %v777_v42  ;;  %v780_v53 = vld [vmem:[%s1322_s1 + $0xd8] sm:$0xff]  ;;  %v343_v55 = vld [vmem:[%s1322_s1 + $0x70] sm:$0xff]  ;;  %s292_s12 = scalar_lea.vmem %s1327_s6, %s1330_s25 }
   0xf   : > { %s284_s28 = scalar_lea.vmem %s1321_s0, %s806_s17  ;;  %v1023_v54 = vpack.c.bf16 %v342_v49, %v341_v48  ;;  %v344_v56 = vld [vmem:[%s1322_s1 + $0x78] sm:$0xff]  ;;  %v987_v57 = vpack.c.bf16 %v780_v53, %v779_v52  ;;  %v781_v58 = vld [vmem:[%s1322_s1 + $0xe0] sm:$0xff]  ;;  %v782_v59 = vld [vmem:[%s1322_s1 + $0xe8] sm:$0xff]  ;;  %s289_s10 = scalar_lea.vmem %s1326_s5, %s806_s17 }
  0x10   : > { %v296_v14 = vld [vmem:[%s284_s28] sm:$0xff]  ;;  %v297_v15 = vld [vmem:[%s284_s28 + $0x8] sm:$0xff]  ;;  %974 = vmatpush3.bf16.msra.mxu1 %v971_v28  ;;  %v1027_v60 = vpack.c.bf16 %v344_v56, %v343_v55  ;;  %v991_v63 = vpack.c.bf16 %v782_v59, %v781_v58  ;;  %v783_v0 = vld [vmem:[%s1322_s1 + $0xf0] sm:$0xff]  ;;  %s295_s15 = scalar_lea.vmem %s1328_s7, %s1330_s25 }
  0x11   : > { %v305_v17 = vmul.f32 %v767_v16, %v296_v14  ;;  %v306_v18 = vmul.f32 %v767_v16, %v297_v15  ;;  %1010 = vmatpush3.bf16.msra.mxu0 %v1007_v9  ;;  %976 = vmatprep.subr.bf16.mxu1 %v975_v32  ;;  %v787_v61 = vld [vmem:[%s1322_s1 + $0x100] sm:$0xff]  ;;  %v788_v62 = vld [vmem:[%s1322_s1 + $0x108] sm:$0xff]  ;;  %v784_v1 = vld [vmem:[%s1322_s1 + $0xf8] sm:$0xff] }
  0x12   : > { %1012 = vmatprep.subr.bf16.mxu0 %v1011_v22  ;;  %v1031_v2 = vpack.c.bf16 %v788_v62, %v787_v61  ;;  %v789_v5 = vld [vmem:[%s1322_s1 + $0x110] sm:$0xff]  ;;  %v790_v6 = vld [vmem:[%s1322_s1 + $0x118] sm:$0xff]  ;;  %v995_v7 = vpack.c.bf16 %v784_v1, %v783_v0  ;;  %v791_v12 = vld [vmem:[%s1322_s1 + $0x120] sm:$0xff] }
  0x13   : > { %v314_v23 = vadd.f32 %v768_v19, %v305_v17  ;;  %v315_v24 = vadd.f32 %v768_v19, %v306_v18  ;;  %v1035_v9 = vpack.c.bf16 %v790_v6, %v789_v5  ;;  %v792_v13 = vld [vmem:[%s1322_s1 + $0x128] sm:$0xff]  ;;  %v793_v16 = vld [vmem:[%s1322_s1 + $0x130] sm:$0xff]  ;;  %v794_v17 = vld [vmem:[%s1322_s1 + $0x138] sm:$0xff] }
  0x14   : > { %978 = vmatpush3.bf16.msra.mxu1 %v975_v32  ;;  %v1039_v14 = vpack.c.bf16 %v792_v13, %v791_v12  ;;  %v1043_v18 = vpack.c.bf16 %v794_v17, %v793_v16  ;;  %v795_v19 = vld [vmem:[%s1322_s1 + $0x140] sm:$0xff]  ;;  %v796_v20 = vld [vmem:[%s1322_s1 + $0x148] sm:$0xff]  ;;  %v801_v28 = vld [vmem:[%s1322_s1 + $0x170] sm:$0xff] }
  0x15   : > { %v316_v30 = vmax.f32 %v314_v23, 0.0  ;;  %v317_v31 = vmax.f32 %v315_v24, 0.0  ;;  %1014 = vmatpush3.bf16.msra.mxu0 %v1011_v22  ;;  %980 = vmatprep.subr.bf16.mxu1 %v979_v40  ;;  %v1047_v21 = vpack.c.bf16 %v796_v20, %v795_v19  ;;  %v797_v22 = vld [vmem:[%s1322_s1 + $0x150] sm:$0xff]  ;;  %v798_v23 = vld [vmem:[%s1322_s1 + $0x158] sm:$0xff]  ;;  %v799_v25 = vld [vmem:[%s1322_s1 + $0x160] sm:$0xff] }
  0x16   : > { %1016 = vmatprep.subr.bf16.mxu0 %v1015_v35  ;;  %v1051_v24 = vpack.c.bf16 %v798_v23, %v797_v22  ;;  %v800_v26 = vld [vmem:[%s1322_s1 + $0x168] sm:$0xff]  ;;  %v802_v29 = vld [vmem:[%s1322_s1 + $0x178] sm:$0xff] }
  0x17   : > { %v321_v36 = vrot.slane %v316_v30, 7  ;;  %v322_v37 = vrot.slane %v317_v31, 7  ;;  %v1055_v27 = vpack.c.bf16 %v800_v26, %v799_v25  ;;  %v1059_v30 = vpack.c.bf16 %v802_v29, %v801_v28 }
  0x18   : > { %982 = vmatpush3.bf16.msra.mxu1 %v979_v40 }
  0x19   : > { %929 = vmatprep.mubr.msk.f32.mxu0 %vm785_vm1, %v321_v36  ;;  %v1207_v41 = vsel %vm320_vm0, %v321_v36, %v322_v37  ;;  %v327_v44 = vsel %vm320_vm0, 0.0, %v321_v36  ;;  %1018 = vmatpush3.bf16.msra.mxu0 %v1015_v35  ;;  %v328_v8 = vsel %vm320_vm0, %v322_v37, 0.0  ;;  %v803_v36 = vld [vmem:[%s1323_s2] ss:$0 sm:$0xff] }
  0x1a   : > { %v366_v45 = vrot.slane %v1207_v41, 1  ;;  %v365_v46 = vrot.slane %v327_v44, 1  ;;  %1020 = vmatprep.subr.bf16.mxu0 %v1019_v47  ;;  %984 = vmatprep.subr.bf16.mxu1 %v983_v50  ;;  %v541_v3 = vrot.slane %v1207_v41, 2  ;;  %v540_v4 = vrot.slane %v327_v44, 2 }
  0x1b   : > { %v368_v10 = vrot.slane %v328_v8, 1  ;;  %v543_v31 = vrot.slane %v328_v8, 2 }
  0x1c   : > { %v367_v51 = vsel %vm364_vm2, %v365_v46, %v366_v45  ;;  %986 = vmatpush3.bf16.msra.mxu1 %v983_v50  ;;  %v542_v11 = vsel %vm539_vm3, %v540_v4, %v541_v3 }
  0x1d   : > { %894 = vmatprep.mubr.f32.mxu1 %v367_v51  ;;  %1022 = vmatpush3.bf16.msra.mxu0 %v1019_v47  ;;  %v369_v15 = vsel %vm364_vm2, %v366_v45, %v368_v10  ;;  %v544_v32 = vsel %vm539_vm3, %v541_v3, %v543_v31 }
  0x1e   : > { %1024 = vmatprep.subr.bf16.mxu0 %v1023_v54  ;;  %988 = vmatprep.subr.bf16.mxu1 %v987_v57 }
  0x20   : > { %990 = vmatpush3.bf16.msra.mxu1 %v987_v57 }
  0x21   : > { %1026 = vmatpush3.bf16.msra.mxu0 %v1023_v54  ;;  %992 = vmatprep.subr.bf16.mxu1 %v991_v63 }
  0x22   : > { %1028 = vmatprep.subr.bf16.mxu0 %v1027_v60 }
  0x24   : > { %994 = vmatpush3.bf16.msra.mxu1 %v991_v63 }
  0x25   : > { %1030 = vmatpush3.bf16.msra.mxu0 %v1027_v60  ;;  %996 = vmatprep.subr.bf16.mxu1 %v995_v7 }
  0x26   : > { %1032 = vmatprep.subr.bf16.mxu0 %v1031_v2 }
  0x28   : > { %930 = vmatmul.mubr.f32.vlgmr.msra.gmra.mrb[0].mxu0 %v1207_v41  ;;  %998 = vmatpush3.bf16.msra.mxu1 %v995_v7 }
  0x29   : > { %1034 = vmatpush3.bf16.msra.mxu0 %v1031_v2  ;;  %964 = vmatprep.mubr.f32.mxu0 %v542_v11 }
  0x2a   : > { %1036 = vmatprep.subr.bf16.mxu0 %v1035_v9 }
  0x2b   : > { %895 = vmatmul.mubr.f32.vlgmr.msra.gmra.mrb[0].mxu1 %v369_v15 }
  0x2d   : > { %1038 = vmatpush3.bf16.msra.mxu0 %v1035_v9 }
  0x2e   : > { %1040 = vmatprep.subr.bf16.mxu0 %v1039_v14 }
  0x31   : > { %1042 = vmatpush3.bf16.msra.mxu0 %v1039_v14 }
  0x32   : > { %1044 = vmatprep.subr.bf16.mxu0 %v1043_v18 }
  0x35   : > { %1046 = vmatpush3.bf16.msra.mxu0 %v1043_v18 }
  0x36   : > { %1048 = vmatprep.subr.bf16.mxu0 %v1047_v21 }
  0x39   : > { %1050 = vmatpush3.bf16.msra.mxu0 %v1047_v21 }
  0x3a   : > { %1052 = vmatprep.subr.bf16.mxu0 %v1051_v24 }
  0x3d   : > { %1054 = vmatpush3.bf16.msra.mxu0 %v1051_v24 }
  0x3e   : > { %1056 = vmatprep.subr.bf16.mxu0 %v1055_v27 }
  0x41   : > { %1058 = vmatpush3.bf16.msra.mxu0 %v1055_v27 }
  0x42   : > { %1060 = vmatprep.subr.bf16.mxu0 %v1059_v30 }
  0x45   : > { %1062 = vmatpush3.bf16.msra.mxu0 %v1059_v30 }
  0x48   : > { %965 = vmatmul.mubr.f32.vlgmr.msra.gmra.mrb[0].mxu0 %v544_v32 }
  0xfe   : > { %v896_v33 = vpop.f32.mrb[0].mxu1 }
  0xff   : > { %v438_v34 = vpop.f32.mrb[1].mxu1 }
 0x11b   : > { %v966_v35 = vpop.f32.mrb[0].mxu0 }
 0x11c   : > { %v1063_v37 = vadd.f32 %v966_v35, %v896_v33  ;;  %v613_v38 = vpop.f32.mrb[1].mxu0 }
 0x11d   : > { %v1064_v39 = vadd.f32 %v613_v38, %v438_v34 }
 0x11e   : > { %v632_v40 = vadd.f32 %v1063_v37, %v803_v36 }
 0x11f   : > { %v631_v41 = vadd.f32 %v1064_v39, %v803_v36 }
 0x120   : > { %634 = vst [vmem:[%s289_s10 + $0x8] sm:$0xff] %v632_v40  ;;  %v644_v42 = vmul.f32 %v632_v40, %v632_v40 }
 0x121   : > { %633 = vst [vmem:[%s289_s10] sm:$0xff] %v631_v41  ;;  %v635_v43 = vadd.f32 %v632_v40, %v631_v41  ;;  %v643_v44 = vmul.f32 %v631_v41, %v631_v41 }
 0x123   : > { %v636_v45 = vrot.slane %v635_v43, 4  ;;  %v645_v46 = vadd.f32 %v644_v42, %v643_v44 }
 0x125   : > { %v637_v47 = vadd.f32 %v636_v45, %v635_v43  ;;  %v646_v48 = vrot.slane %v645_v46, 4 }
 0x127   : > { %v638_v49 = vrot.slane %v637_v47, 2  ;;  %v647_v50 = vadd.f32 %v646_v48, %v645_v46 }
 0x129   : > { %v639_v51 = vadd.f32 %v638_v49, %v637_v47  ;;  %v648_v52 = vrot.slane %v647_v50, 2 }
 0x12b   : > { %v640_v53 = vrot.slane %v639_v51, 1  ;;  %v649_v54 = vadd.f32 %v648_v52, %v647_v50 }
 0x12d   : > { %v641_v55 = vadd.f32 %v640_v53, %v639_v51  ;;  %v650_v56 = vrot.slane %v649_v54, 1 }
 0x12f   : > { %642 = vst [vmem:[%s292_s12] sm:$0x1] %v641_v55  ;;  %v651_v57 = vadd.f32 %v650_v56, %v649_v54 }
 0x131   : > { %652 = vst [vmem:[%s295_s15] sm:$0x1] %v651_v57 }
 0x132 PF: > { %s18_s24 = sadd.s32 1, %s1081_s24  }
 0x133   : > { %p15_p4 = scmp.ge.s32.totalorder %s18_s24, 4  }
 0x135   :  { %17 = sbr.rel (!%p15_p4) target bundleno = 1 (0x1), region = 96 }

// kernel: double_conv_forward.5
= control target key start
LH: loop header
LB: loop body
LE: loop exit
PB: predicated region body
PF: predicated region fallthrough
CT: control target
= control target key end

     0   :  { %s301_s12 = smov 0   ;;  %s318_s0 = inlined_call_operand.vmem [shape: f32[2,16,128], index: 0, kind: input, shape index: {}, may-alias: {0,3}]   ;;  %s319_s1 = inlined_call_operand.vmem [shape: f32[1,128], index: 1, kind: input, shape index: {}]   ;;  %s320_s2 = inlined_call_operand.vmem [shape: f32[1,128], index: 2, kind: input, shape index: {}]   ;;  %s321_s3 = inlined_call_operand.vmem [shape: f32[2,16,128], index: 3, kind: output, shape index: {}, may-alias: {0,3}]  }
   0x1 LB: > { %s250_s13 = sadd.s32 4294967295, %s279_s12   ;;  %p254_p0 = scmp.ge.s32.totalorder %s279_s12, 1  ;;  %s279_s12 = sphi %s301_s12, %s13_s12  }
   0x2   : > { %p137_p1 = scmp.lt.s32.totalorder %s279_s12, 3 }
   0x4   : > { %p138_p2 = pnand %p254_p0, %p137_p1 }
   0x5   : > { %p161_p3 = scmp.lt.s32.totalorder (!%p138_p2), %s250_s13, 1  ;;  %v259_v0 = vld [vmem:[%s319_s1] ss:$0 sm:$0xff] (!%p138_p2) }
   0x6   : > { %141 = sbr.rel (%p138_p2) target bundleno = 24 (0x18), region = 32  ;;  %v260_v3 = vld [vmem:[%s320_s2] ss:$0 sm:$0xff] (!%p138_p2) }
   0xd   : > { %s323_s13 = smov (!%p161_p3, %s250_s13), 1 }
   0xe   : > { %s263_s14 = sshll.u32 %s323_s13, 4 }
   0xf   : > { %s165_s19 = scalar_lea.vmem %s318_s0, %s263_s14  ;;  %s170_s24 = scalar_lea.vmem %s321_s3, %s263_s14 }
  0x10   : > { %v171_v1 = vld [vmem:[%s165_s19] sm:$0xff]  ;;  %v172_v2 = vld [vmem:[%s165_s19 + $0x8] sm:$0xff] }
  0x11   : > { %v180_v4 = vmul.f32 %v259_v0, %v171_v1  ;;  %v181_v5 = vmul.f32 %v259_v0, %v172_v2 }
  0x13   : > { %v189_v6 = vadd.f32 %v260_v3, %v180_v4  ;;  %v190_v7 = vadd.f32 %v260_v3, %v181_v5 }
  0x15   : > { %v191_v8 = vmax.f32 %v189_v6, 0.0  ;;  %v192_v9 = vmax.f32 %v190_v7, 0.0 }
  0x17   : > { %193 = vst [vmem:[%s170_s24] sm:$0xff] %v191_v8  ;;  %194 = vst [vmem:[%s170_s24 + $0x8] sm:$0xff] %v192_v9 }
  0x18 PF: > { %s13_s12 = sadd.s32 1, %s279_s12  }
  0x19   : > { %p10_p4 = scmp.ge.s32.totalorder %s13_s12, 4  }
  0x1b   :  { %12 = sbr.rel (!%p10_p4) target bundleno = 1 (0x1), region = 62 }

</bundles_post_ra>
